<compile_context>
chip_gen: v7x
topology: tpu7x:2x2x1
jax: 0.10.0
libtpu: 0.0.40
codegen_flags: <defaults>
</compile_context>

<pallas_src>
import jax
import jax.numpy as jnp
from jax import lax
from jax.experimental import pallas as pl
from jax.experimental.pallas import tpu as pltpu


# -----------------------------------------------------------------------------
# Helpers: alignment, VMEM budgeting, single-buffered-constant fallback.
# -----------------------------------------------------------------------------
def _round_up(x, m):
    return (x + m - 1) // m * m


def _lane_align():
    """Alignment for the bilinear contraction dim Ap: 256 on v6e/v7x (2x256^2 MXU
    passes), 128 elsewhere (v5e/v4 have 128-wide passes; don't pay extra padding)."""
    try:
        kind = jax.devices()[0].device_kind.lower()
    except Exception:
        return 128
    if ("v6" in kind) or ("v7" in kind) or ("tpu7" in kind):
        return 256
    return 128


def _vmem_capacity():
    try:
        return int(pltpu.get_tpu_info().vmem_capacity_bytes)
    except Exception:
        return 64 * 1024 * 1024            # conservative default (v7x per-TC)


def _vmem_block_bytes(shape, dtype):
    """Approx VMEM bytes for one buffered block (ceil to native (sublane,128) tiles;
    sub-32-bit dtypes pack along sublanes)."""
    itemsize = jnp.dtype(dtype).itemsize
    if len(shape) < 2:
        return 4096
    sub = {4: 8, 2: 16, 1: 32}.get(itemsize, 8)
    lead = 1
    for d in shape[:-2]:
        lead *= int(d)
    return lead * _round_up(int(shape[-2]), sub) * _round_up(int(shape[-1]), 128) * itemsize


def _mosaic_params(semantics, footprint_bytes):
    cap = _vmem_capacity()
    limit = max(int(1.25 * footprint_bytes) + (4 << 20), 32 << 20)
    limit = int(min(limit, int(0.9 * cap)))
    return pltpu.CompilerParams(dimension_semantics=semantics,
                                vmem_limit_bytes=limit)


# Some Pallas builds may not accept pipeline_mode on the outer pallas_call; probe by
# attempting the single-buffered-constants build first and falling back once.
_SINGLE_BUF_CONSTS = [True]


def _const_spec(block_shape, index_map, single_buf):
    if single_buf:
        return pl.BlockSpec(block_shape, index_map, pipeline_mode=pl.Buffered(1))
    return pl.BlockSpec(block_shape, index_map)


def _call_with_const_fallback(build_and_call):
    if _SINGLE_BUF_CONSTS[0]:
        try:
            return build_and_call(True)
        except Exception:
            _SINGLE_BUF_CONSTS[0] = False
    return build_and_call(False)


def _elu(z):
    # f32 VPU/EUP math (v5e has no bf16 VPU/EUP); clamp the exp argument so the
    # unselected branch never produces inf.
    return jnp.where(z > 0, z, jnp.exp(jnp.minimum(z, 0.0)) - 1.0)


# -----------------------------------------------------------------------------
# Kernel 1: fused Linear + ELU for all four projection heads in ONE matmul.
#   Fused weight layout (all offsets multiples of 128, all widths lane-dense):
#     [ arc_h_aug (Ap) | arc_c_aug (Ap) | type_h (Tp) | type_c (Tp) ]
#   Arc segments are emitted in augmented form [elu(xW+b), 1, 0...] and are
#   pre-multiplied by the mask (folds mask_d/mask_e of BiAAttention).
# -----------------------------------------------------------------------------
def _proj_elu_kernel(x_ref, w_ref, b_ref, m_ref,
                     arc_h_ref, arc_c_ref, type_h_ref, type_c_ref):
    Ap = arc_h_ref.shape[-1]
    Tp = type_h_ref.shape[-1]
    z = jnp.dot(x_ref[...], w_ref[...],
                preferred_element_type=jnp.float32) + b_ref[...]
    y = _elu(z)                                        # (tm, 2*Ap + 2*Tp) f32
    arc = y[:, :2 * Ap] * m_ref[...]                   # fold mask into arc heads
    arc_h_ref[...] = arc[:, :Ap].astype(arc_h_ref.dtype)
    arc_c_ref[...] = arc[:, Ap:].astype(arc_c_ref.dtype)
    type_h_ref[...] = y[:, 2 * Ap:2 * Ap + Tp].astype(type_h_ref.dtype)
    type_c_ref[...] = y[:, 2 * Ap + Tp:].astype(type_c_ref.dtype)


def proj_elu(x, w_all, b_all, mask_flat, Ap, Tp, *, tm=512):
    M, Din = x.shape
    Ntot = w_all.shape[1]
    tm = min(tm, M)

    def footprint(t, single_buf):
        nconst = 1 if single_buf else 2
        return (2 * _vmem_block_bytes((t, Din), jnp.bfloat16)
                + nconst * _vmem_block_bytes((Din, Ntot), jnp.bfloat16)
                + nconst * _vmem_block_bytes((1, Ntot), jnp.float32)
                + 2 * _vmem_block_bytes((t, 1), jnp.float32)
                + 2 * 2 * _vmem_block_bytes((t, Ap), jnp.bfloat16)
                + 2 * 2 * _vmem_block_bytes((t, Tp), jnp.float32))

    budget = int(0.75 * _vmem_capacity())
    while tm > 64 and footprint(tm, False) > budget:   # fit v7x's 64 MiB too
        tm = max(64, tm // 2)

    def build_and_call(single_buf):
        return pl.pallas_call(
            _proj_elu_kernel,
            out_shape=(
                jax.ShapeDtypeStruct((M, Ap), jnp.bfloat16),   # arc_h_aug (masked)
                jax.ShapeDtypeStruct((M, Ap), jnp.bfloat16),   # arc_c_aug (masked)
                jax.ShapeDtypeStruct((M, Tp), jnp.float32),    # type_h (lane-padded)
                jax.ShapeDtypeStruct((M, Tp), jnp.float32),    # type_c (lane-padded)
            ),
            grid=(pl.cdiv(M, tm),),
            in_specs=[
                pl.BlockSpec((tm, Din), lambda i: (i, 0)),
                _const_spec((Din, Ntot), lambda i: (0, 0), single_buf),
                _const_spec((1, Ntot), lambda i: (0, 0), single_buf),
                pl.BlockSpec((tm, 1), lambda i: (i, 0)),
            ],
            out_specs=(
                pl.BlockSpec((tm, Ap), lambda i: (i, 0)),
                pl.BlockSpec((tm, Ap), lambda i: (i, 0)),
                pl.BlockSpec((tm, Tp), lambda i: (i, 0)),
                pl.BlockSpec((tm, Tp), lambda i: (i, 0)),
            ),
            compiler_params=_mosaic_params(("parallel",),
                                           footprint(tm, single_buf)),
        )(x, w_all, b_all, mask_flat)

    return _call_with_const_fallback(build_and_call)


# -----------------------------------------------------------------------------
# Kernel 2: BiAAttention (biaffine arc scoring), num_labels = 1.
#   With h_aug = m_i*[h,1,0..], cT_aug = (m_j*[c,1,0..])^T and
#   U_aug = [[U, Wd^T],[We, b]] (zero padded):
#     out[b,i,j] = h_aug[b,i] @ U_aug @ cT_aug[b,:,j]
#                = m_i*m_j*(h U c^T + Wd.h + We.c + b)
#   (matches the PyTorch forward's attention(...).squeeze(dim=1) with masks).
#   c is pre-transposed -> second matmul is a plain [tl,Ap]@[Ap,Lp]; the cT and
#   U_aug blocks are constant across the row-tile axis, so they are DMA'd once.
# -----------------------------------------------------------------------------
def _biaffine_kernel(h_ref, ct_ref, u_ref, o_ref):
    hu = jnp.dot(h_ref[0], u_ref[...], preferred_element_type=jnp.float32)
    s = jnp.dot(hu.astype(jnp.bfloat16), ct_ref[0],
                preferred_element_type=jnp.float32)
    o_ref[0] = s.astype(o_ref.dtype)


def biaffine_attention(arc_h_aug, arc_cT, u_aug, *, tl=256):
    B, Lp, Ap = arc_h_aug.shape
    tl = min(tl, Lp)

    def footprint(t, single_buf):
        nconst = 1 if single_buf else 2
        return (2 * _vmem_block_bytes((1, t, Ap), jnp.bfloat16)
                + 2 * _vmem_block_bytes((1, Ap, Lp), jnp.bfloat16)
                + nconst * _vmem_block_bytes((Ap, Ap), jnp.bfloat16)
                + 2 * _vmem_block_bytes((1, t, Lp), jnp.float32))

    budget = int(0.75 * _vmem_capacity())
    while tl > 128 and footprint(tl, False) > budget:
        tl = max(128, tl // 2)

    def build_and_call(single_buf):
        return pl.pallas_call(
            _biaffine_kernel,
            out_shape=jax.ShapeDtypeStruct((B, Lp, Lp), jnp.float32),
            grid=(B, pl.cdiv(Lp, tl)),   # 2 axes, both parallel -> shards on v7x's 2 TCs
            in_specs=[
                pl.BlockSpec((1, tl, Ap), lambda b, i: (b, i, 0)),
                pl.BlockSpec((1, Ap, Lp), lambda b, i: (b, 0, 0)),
                _const_spec((Ap, Ap), lambda b, i: (0, 0), single_buf),
            ],
            out_specs=pl.BlockSpec((1, tl, Lp), lambda b, i: (b, i, 0)),
            compiler_params=_mosaic_params(("parallel", "parallel"),
                                           footprint(tl, single_buf)),
        )(arc_h_aug, arc_cT, u_aug)

    return _call_with_const_fallback(build_and_call)


# -----------------------------------------------------------------------------
# Packed / augmented parameter construction (shared with the bf16-path reference).
# -----------------------------------------------------------------------------
def _packed_weights(params, Din, Ap, Tp):
    A = params["arc_space"]
    T = params["type_space"]
    Ntot = 2 * Ap + 2 * Tp
    f32 = jnp.float32

    # Fused projection weight; arc segments carry the homogeneous "1" coordinate:
    # zero weights + bias 1.0 at column A (ELU(1)=1; ELU(0)=0 for padding columns).
    w_all = jnp.zeros((Din, Ntot), f32)
    w_all = (w_all.at[:, 0:A].set(params["arc_h_w"])
                  .at[:, Ap:Ap + A].set(params["arc_c_w"])
                  .at[:, 2 * Ap:2 * Ap + T].set(params["type_h_w"])
                  .at[:, 2 * Ap + Tp:2 * Ap + Tp + T].set(params["type_c_w"]))
    b_all = jnp.zeros((Ntot,), f32)
    b_all = (b_all.at[0:A].set(params["arc_h_b"]).at[A].set(1.0)
                  .at[Ap:Ap + A].set(params["arc_c_b"]).at[Ap + A].set(1.0)
                  .at[2 * Ap:2 * Ap + T].set(params["type_h_b"])
                  .at[2 * Ap + Tp:2 * Ap + Tp + T].set(params["type_c_b"]))

    # Augmented biaffine tensor [[U, Wd^T], [We, b]], zero-padded to (Ap, Ap).
    u_aug = jnp.zeros((Ap, Ap), f32)
    u_aug = (u_aug.at[0:A, 0:A].set(params["att_U"])
                  .at[0:A, A].set(params["att_Wd"][0])
                  .at[A, 0:A].set(params["att_We"][0])
                  .at[A, A].set(params["att_b"][0]))
    return w_all, b_all, u_aug


# -----------------------------------------------------------------------------
# Forward wrapper: mirrors BiRecurrentConvBiAffine.forward semantics starting
# from the encoder output (post-RNN) tensor.
# -----------------------------------------------------------------------------
def birecurrent_biaffine_forward(encoder_out, mask, params):
    """
    encoder_out : [B, L, 2*hidden]  (stand-in for the VarMaskedFastLSTM output)
    mask        : [B, L] float32
    returns (out_arc [B,L,L], (type_h [B,L,Ts], type_c [B,L,Ts]), mask, length=None)
    """
    B, L, Din = encoder_out.shape
    T = params["type_space"]

    align = _lane_align()
    Ap = _round_up(params["arc_space"] + 1, align)   # augmented + MXU-aligned
    Tp = _round_up(T, 128)                           # lane-dense type-head width
    Lp = _round_up(L, 128)                           # lane-dense arc-score width
    Ntot = 2 * Ap + 2 * Tp

    f32, bf16 = jnp.float32, jnp.bfloat16
    w_all, b_all, u_aug = _packed_weights(params, Din, Ap, Tp)

    mask = mask.astype(f32)
    arc_h, arc_c, type_h_p, type_c_p = proj_elu(
        encoder_out.reshape(B * L, Din).astype(bf16),
        w_all.astype(bf16),
        b_all.reshape(1, Ntot),
        mask.reshape(B * L, 1),
        Ap, Tp,
    )
    # dropout_out / rnn dropout are identity in eval mode.
    type_h = type_h_p[:, :T].reshape(B, L, T)
    type_c = type_c_p[:, :T].reshape(B, L, T)

    arc_h = arc_h.reshape(B, L, Ap)
    arc_c = arc_c.reshape(B, L, Ap)
    if Lp != L:
        # Zero rows score zero (mask already folded) and are sliced off below;
        # padding keeps the [tl, Lp] output stores fully lane-dense.
        arc_h = jnp.pad(arc_h, ((0, 0), (0, Lp - L), (0, 0)))
        arc_c = jnp.pad(arc_c, ((0, 0), (0, Lp - L), (0, 0)))
    # Pre-transpose c so the biaffine kernel does a plain [tl,Ap]@[Ap,Lp].
    arc_cT = jnp.swapaxes(arc_c, 1, 2)

    out_full = biaffine_attention(arc_h, arc_cT, u_aug.astype(bf16))
    out_arc = out_full[:, :L, :L] if Lp != L else out_full
    return out_arc, (type_h, type_c), mask, None


# -----------------------------------------------------------------------------
# References for the correctness check.
# -----------------------------------------------------------------------------
def _reference_f32(encoder_out, mask, params):
    P = lax.Precision.HIGHEST

    def elu(z):
        return jnp.where(z > 0, z, jnp.exp(jnp.minimum(z, 0.0)) - 1.0)

    arc_h = elu(jnp.dot(encoder_out, params["arc_h_w"], precision=P) + params["arc_h_b"])
    arc_c = elu(jnp.dot(encoder_out, params["arc_c_w"], precision=P) + params["arc_c_b"])
    type_h = elu(jnp.dot(encoder_out, params["type_h_w"], precision=P) + params["type_h_b"])
    type_c = elu(jnp.dot(encoder_out, params["type_c_w"], precision=P) + params["type_c_b"])

    s = jnp.einsum("bia,ac,bjc->bij", arc_h, params["att_U"], arc_c, precision=P)
    d = jnp.einsum("bia,a->bi", arc_h, params["att_Wd"][0], precision=P)[:, :, None]
    e = jnp.einsum("bja,a->bj", arc_c, params["att_We"][0], precision=P)[:, None, :]
    s = (s + d + e + params["att_b"][0]) * mask[:, :, None] * mask[:, None, :]
    return s, type_h, type_c


def _reference_bf16_path(encoder_out, mask, params, Ap, Tp):
    """Mirrors the kernel's quantization points (bf16 MXU operands, f32 accumulate,
    bf16 re-quantization of the h@U intermediate) so arc scores check tightly."""
    P = lax.Precision.HIGHEST
    f32, bf16 = jnp.float32, jnp.bfloat16
    B, L, Din = encoder_out.shape
    w_all, b_all, u_aug = _packed_weights(params, Din, Ap, Tp)

    x = encoder_out.reshape(B * L, Din).astype(bf16).astype(f32)
    w = w_all.astype(bf16).astype(f32)
    z = jnp.dot(x, w, precision=P) + b_all
    y = jnp.where(z > 0, z, jnp.exp(jnp.minimum(z, 0.0)) - 1.0)
    arc = y[:, :2 * Ap] * mask.reshape(B * L, 1)
    h = arc[:, :Ap].astype(bf16).astype(f32).reshape(B, L, Ap)
    c = arc[:, Ap:2 * Ap].astype(bf16).astype(f32).reshape(B, L, Ap)
    u = u_aug.astype(bf16).astype(f32)
    hu = jnp.einsum("bia,ac->bic", h, u, precision=P)
    hu = hu.astype(bf16).astype(f32)
    return jnp.einsum("bic,bjc->bij", hu, c, precision=P)


if __name__ == "__main__":
    # Small shapes consistent with the module's forward.
    B, L = 2, 8
    hidden_size = 32
    out_dim = hidden_size * 2        # RNN is bidirectional
    arc_space = 64
    type_space = 32

    key = jax.random.PRNGKey(0)
    keys = jax.random.split(key, 12)

    params = {
        "arc_space": arc_space,
        "type_space": type_space,
        "arc_h_w": jax.random.normal(keys[0], (out_dim, arc_space), jnp.float32) * 0.1,
        "arc_h_b": jax.random.normal(keys[1], (arc_space,), jnp.float32) * 0.1,
        "arc_c_w": jax.random.normal(keys[2], (out_dim, arc_space), jnp.float32) * 0.1,
        "arc_c_b": jax.random.normal(keys[3], (arc_space,), jnp.float32) * 0.1,
        "type_h_w": jax.random.normal(keys[4], (out_dim, type_space), jnp.float32) * 0.1,
        "type_h_b": jax.random.normal(keys[5], (type_space,), jnp.float32) * 0.1,
        "type_c_w": jax.random.normal(keys[6], (out_dim, type_space), jnp.float32) * 0.1,
        "type_c_b": jax.random.normal(keys[7], (type_space,), jnp.float32) * 0.1,
        # BiAAttention params (num_labels = 1)
        "att_U": jax.random.normal(keys[8], (arc_space, arc_space), jnp.float32) * 0.05,
        "att_Wd": jax.random.normal(keys[9], (1, arc_space), jnp.float32) * 0.1,
        "att_We": jax.random.normal(keys[10], (1, arc_space), jnp.float32) * 0.1,
        "att_b": jnp.zeros((1,), jnp.float32),
    }

    # Simulated encoder (RNN) output and a mask with one padded position.
    encoder_out = jax.random.normal(keys[11], (B, L, out_dim), jnp.float32)
    mask = jnp.ones((B, L), jnp.float32).at[1, L - 1].set(0.0)

    out_arc, (type_h, type_c), mask_out, length = birecurrent_biaffine_forward(
        encoder_out, mask, params
    )
    jax.block_until_ready((out_arc, type_h, type_c))

    assert out_arc.shape == (B, L, L)
    assert type_h.shape == (B, L, type_space) and type_c.shape == (B, L, type_space)

    # Tight check against a reference that mirrors the kernel's bf16 path.
    Ap = _round_up(arc_space + 1, _lane_align())
    Tp = _round_up(type_space, 128)
    sim_arc = _reference_bf16_path(encoder_out, mask, params, Ap, Tp)
    assert jnp.allclose(out_arc, sim_arc, atol=2e-2, rtol=2e-2), \
        float(jnp.max(jnp.abs(out_arc - sim_arc)))

    # Looser sanity check against the pure-f32 reference (bf16 MXU operands).
    ref_arc, ref_th, ref_tc = _reference_f32(encoder_out, mask, params)
    assert jnp.allclose(out_arc, ref_arc, atol=1e-1, rtol=5e-2)
    assert jnp.allclose(type_h, ref_th, atol=3e-2, rtol=3e-2)
    assert jnp.allclose(type_c, ref_tc, atol=3e-2, rtol=3e-2)

    print("KERNEL_OK")
</pallas_src>

<mosaic_0001>
module attributes {stable_mosaic.version = 11 : i64} {
  func.func @_proj_elu_kernel(%arg0: i32, %arg1: memref<16x64xbf16, #tpu.memory_space<vmem>>, %arg2: memref<64x512xbf16, #tpu.memory_space<vmem>>, %arg3: memref<1x512xf32, #tpu.memory_space<vmem>>, %arg4: memref<16x1xf32, #tpu.memory_space<vmem>>, %arg5: memref<16x128xbf16, #tpu.memory_space<vmem>>, %arg6: memref<16x128xbf16, #tpu.memory_space<vmem>>, %arg7: memref<16x128xf32, #tpu.memory_space<vmem>>, %arg8: memref<16x128xf32, #tpu.memory_space<vmem>>) attributes {dimension_semantics = [#tpu.dimension_semantics<parallel>], iteration_bounds = array<i64: 1>, scalar_prefetch = 0 : i64, scratch_operands = 0 : i64, tpu.core_type = #tpu.core_type<tc>, window_params = [{transform_indices = @transform_0, window_bounds = array<i64: 16, 64>}, {pipeline_mode = #tpu.pipeline_mode<synchronous>, transform_indices = @transform_1, window_bounds = array<i64: 64, 512>}, {pipeline_mode = #tpu.pipeline_mode<synchronous>, transform_indices = @transform_2, window_bounds = array<i64: 1, 512>}, {transform_indices = @transform_3, window_bounds = array<i64: 16, 1>}, {transform_indices = @transform_4, window_bounds = array<i64: 16, 128>}, {transform_indices = @transform_5, window_bounds = array<i64: 16, 128>}, {transform_indices = @transform_6, window_bounds = array<i64: 16, 128>}, {transform_indices = @transform_7, window_bounds = array<i64: 16, 128>}]} {
    %c0 = arith.constant 0 : index
    %c0_0 = arith.constant 0 : index
    %0 = vector.load %arg1[%c0, %c0_0] : memref<16x64xbf16, #tpu.memory_space<vmem>>, vector<16x64xbf16>
    %c0_1 = arith.constant 0 : index
    %c0_2 = arith.constant 0 : index
    %1 = vector.load %arg2[%c0_1, %c0_2] : memref<64x512xbf16, #tpu.memory_space<vmem>>, vector<64x512xbf16>
    %cst = arith.constant dense<0.000000e+00> : vector<16x512xf32>
    %2 = tpu.matmul %0, %1, %cst {dimension_numbers = #tpu.dot_dimension_numbers<[1], [0], [0], [1], [0, 0, 1, 1], [], []>} : vector<16x64xbf16>, vector<64x512xbf16>, vector<16x512xf32> -> vector<16x512xf32>
    %c0_3 = arith.constant 0 : index
    %c0_4 = arith.constant 0 : index
    %3 = vector.load %arg3[%c0_3, %c0_4] : memref<1x512xf32, #tpu.memory_space<vmem>>, vector<1x512xf32>
    %4 = vector.broadcast %3 : vector<1x512xf32> to vector<16x512xf32>
    %5 = arith.addf %2, %4 : vector<16x512xf32>
    %cst_5 = arith.constant 0.000000e+00 : f32
    %6 = vector.broadcast %cst_5 : f32 to vector<16x512xf32>
    %7 = arith.cmpf ogt, %5, %6 : vector<16x512xf32>
    %cst_6 = arith.constant 0.000000e+00 : f32
    %8 = vector.broadcast %cst_6 : f32 to vector<16x512xf32>
    %9 = arith.minimumf %5, %8 : vector<16x512xf32>
    %10 = math.exp %9 : vector<16x512xf32>
    %cst_7 = arith.constant 1.000000e+00 : f32
    %11 = vector.broadcast %cst_7 : f32 to vector<16x512xf32>
    %12 = arith.subf %10, %11 : vector<16x512xf32>
    %13 = arith.select %7, %5, %12 : vector<16x512xi1>, vector<16x512xf32>
    %14 = vector.extract_strided_slice %13 {offsets = [0, 0], sizes = [16, 256], strides = [1, 1]} : vector<16x512xf32> to vector<16x256xf32>
    %c0_8 = arith.constant 0 : index
    %c0_9 = arith.constant 0 : index
    %15 = vector.load %arg4[%c0_8, %c0_9] : memref<16x1xf32, #tpu.memory_space<vmem>>, vector<16x1xf32>
    %16 = vector.broadcast %15 : vector<16x1xf32> to vector<16x256xf32>
    %17 = arith.mulf %14, %16 : vector<16x256xf32>
    %18 = vector.extract_strided_slice %17 {offsets = [0, 0], sizes = [16, 128], strides = [1, 1]} : vector<16x256xf32> to vector<16x128xf32>
    %19 = arith.truncf %18 : vector<16x128xf32> to vector<16x128xbf16>
    %c0_10 = arith.constant 0 : index
    %c0_11 = arith.constant 0 : index
    %20 = vector.load %arg5[%c0_10, %c0_11] : memref<16x128xbf16, #tpu.memory_space<vmem>>, vector<16x128xbf16>
    tpu.vector_store %arg5[%c0_10, %c0_11], %19 {strides = array<i32>} : memref<16x128xbf16, #tpu.memory_space<vmem>>, vector<16x128xbf16>,
    %21 = vector.extract_strided_slice %17 {offsets = [0, 128], sizes = [16, 128], strides = [1, 1]} : vector<16x256xf32> to vector<16x128xf32>
    %22 = arith.truncf %21 : vector<16x128xf32> to vector<16x128xbf16>
    %c0_12 = arith.constant 0 : index
    %c0_13 = arith.constant 0 : index
    %23 = vector.load %arg6[%c0_12, %c0_13] : memref<16x128xbf16, #tpu.memory_space<vmem>>, vector<16x128xbf16>
    tpu.vector_store %arg6[%c0_12, %c0_13], %22 {strides = array<i32>} : memref<16x128xbf16, #tpu.memory_space<vmem>>, vector<16x128xbf16>,
    %24 = vector.extract_strided_slice %13 {offsets = [0, 256], sizes = [16, 128], strides = [1, 1]} : vector<16x512xf32> to vector<16x128xf32>
    %c0_14 = arith.constant 0 : index
    %c0_15 = arith.constant 0 : index
    %25 = vector.load %arg7[%c0_14, %c0_15] : memref<16x128xf32, #tpu.memory_space<vmem>>, vector<16x128xf32>
    tpu.vector_store %arg7[%c0_14, %c0_15], %24 {strides = array<i32>} : memref<16x128xf32, #tpu.memory_space<vmem>>, vector<16x128xf32>,
    %26 = vector.extract_strided_slice %13 {offsets = [0, 384], sizes = [16, 128], strides = [1, 1]} : vector<16x512xf32> to vector<16x128xf32>
    %c0_16 = arith.constant 0 : index
    %c0_17 = arith.constant 0 : index
    %27 = vector.load %arg8[%c0_16, %c0_17] : memref<16x128xf32, #tpu.memory_space<vmem>>, vector<16x128xf32>
    tpu.vector_store %arg8[%c0_16, %c0_17], %26 {strides = array<i32>} : memref<16x128xf32, #tpu.memory_space<vmem>>, vector<16x128xf32>,
    return
  }
  func.func @transform_0(%arg0: i32) -> (i32, i32) {
    %c0_i32 = arith.constant 0 : i32
    %c0_i32_0 = arith.constant 0 : i32
    return %arg0, %c0_i32 : i32, i32
  }
  func.func @transform_1(%arg0: i32) -> (i32, i32) {
    %c0_i32 = arith.constant 0 : i32
    %c0_i32_0 = arith.constant 0 : i32
    %c0_i32_1 = arith.constant 0 : i32
    return %c0_i32, %c0_i32_0 : i32, i32
  }
  func.func @transform_2(%arg0: i32) -> (i32, i32) {
    %c0_i32 = arith.constant 0 : i32
    %c0_i32_0 = arith.constant 0 : i32
    %c0_i32_1 = arith.constant 0 : i32
    return %c0_i32, %c0_i32_0 : i32, i32
  }
  func.func @transform_3(%arg0: i32) -> (i32, i32) {
    %c0_i32 = arith.constant 0 : i32
    %c0_i32_0 = arith.constant 0 : i32
    return %arg0, %c0_i32 : i32, i32
  }
  func.func @transform_4(%arg0: i32) -> (i32, i32) {
    %c0_i32 = arith.constant 0 : i32
    %c0_i32_0 = arith.constant 0 : i32
    return %arg0, %c0_i32 : i32, i32
  }
  func.func @transform_5(%arg0: i32) -> (i32, i32) {
    %c0_i32 = arith.constant 0 : i32
    %c0_i32_0 = arith.constant 0 : i32
    return %arg0, %c0_i32 : i32, i32
  }
  func.func @transform_6(%arg0: i32) -> (i32, i32) {
    %c0_i32 = arith.constant 0 : i32
    %c0_i32_0 = arith.constant 0 : i32
    return %arg0, %c0_i32 : i32, i32
  }
  func.func @transform_7(%arg0: i32) -> (i32, i32) {
    %c0_i32 = arith.constant 0 : i32
    %c0_i32_0 = arith.constant 0 : i32
    return %arg0, %c0_i32 : i32, i32
  }
}

module attributes {stable_mosaic.version = 11 : i64} {
  func.func @_proj_elu_kernel(%arg0: i32, %arg1: memref<16x64xbf16, #tpu.memory_space<vmem>>, %arg2: memref<64x512xbf16, #tpu.memory_space<vmem>>, %arg3: memref<1x512xf32, #tpu.memory_space<vmem>>, %arg4: memref<16x1xf32, #tpu.memory_space<vmem>>, %arg5: memref<16x128xbf16, #tpu.memory_space<vmem>>, %arg6: memref<16x128xbf16, #tpu.memory_space<vmem>>, %arg7: memref<16x128xf32, #tpu.memory_space<vmem>>, %arg8: memref<16x128xf32, #tpu.memory_space<vmem>>) attributes {dimension_semantics = [#tpu.dimension_semantics<parallel>], iteration_bounds = array<i64: 1>, scalar_prefetch = 0 : i64, scratch_operands = 0 : i64, tpu.core_type = #tpu.core_type<tc>, window_params = [{transform_indices = @transform_0, window_bounds = array<i64: 16, 64>}, {pipeline_mode = #tpu.pipeline_mode<synchronous>, transform_indices = @transform_1, window_bounds = array<i64: 64, 512>}, {pipeline_mode = #tpu.pipeline_mode<synchronous>, transform_indices = @transform_2, window_bounds = array<i64: 1, 512>}, {transform_indices = @transform_3, window_bounds = array<i64: 16, 1>}, {transform_indices = @transform_4, window_bounds = array<i64: 16, 128>}, {transform_indices = @transform_5, window_bounds = array<i64: 16, 128>}, {transform_indices = @transform_6, window_bounds = array<i64: 16, 128>}, {transform_indices = @transform_7, window_bounds = array<i64: 16, 128>}]} {
    %c0 = arith.constant 0 : index
    %c0_0 = arith.constant 0 : index
    %0 = vector.load %arg1[%c0, %c0_0] : memref<16x64xbf16, #tpu.memory_space<vmem>>, vector<16x64xbf16>
    %c0_1 = arith.constant 0 : index
    %c0_2 = arith.constant 0 : index
    %1 = vector.load %arg2[%c0_1, %c0_2] : memref<64x512xbf16, #tpu.memory_space<vmem>>, vector<64x512xbf16>
    %cst = arith.constant dense<0.000000e+00> : vector<16x512xf32>
    %2 = tpu.matmul %0, %1, %cst {dimension_numbers = #tpu.dot_dimension_numbers<[1], [0], [0], [1], [0, 0, 1, 1], [], []>} : vector<16x64xbf16>, vector<64x512xbf16>, vector<16x512xf32> -> vector<16x512xf32>
    %c0_3 = arith.constant 0 : index
    %c0_4 = arith.constant 0 : index
    %3 = vector.load %arg3[%c0_3, %c0_4] : memref<1x512xf32, #tpu.memory_space<vmem>>, vector<1x512xf32>
    %4 = vector.broadcast %3 : vector<1x512xf32> to vector<16x512xf32>
    %5 = arith.addf %2, %4 : vector<16x512xf32>
    %cst_5 = arith.constant 0.000000e+00 : f32
    %6 = vector.broadcast %cst_5 : f32 to vector<16x512xf32>
    %7 = arith.cmpf ogt, %5, %6 : vector<16x512xf32>
    %cst_6 = arith.constant 0.000000e+00 : f32
    %8 = vector.broadcast %cst_6 : f32 to vector<16x512xf32>
    %9 = arith.minimumf %5, %8 : vector<16x512xf32>
    %10 = math.exp %9 : vector<16x512xf32>
    %cst_7 = arith.constant 1.000000e+00 : f32
    %11 = vector.broadcast %cst_7 : f32 to vector<16x512xf32>
    %12 = arith.subf %10, %11 : vector<16x512xf32>
    %13 = arith.select %7, %5, %12 : vector<16x512xi1>, vector<16x512xf32>
    %14 = vector.extract_strided_slice %13 {offsets = [0, 0], sizes = [16, 256], strides = [1, 1]} : vector<16x512xf32> to vector<16x256xf32>
    %c0_8 = arith.constant 0 : index
    %c0_9 = arith.constant 0 : index
    %15 = vector.load %arg4[%c0_8, %c0_9] : memref<16x1xf32, #tpu.memory_space<vmem>>, vector<16x1xf32>
    %16 = vector.broadcast %15 : vector<16x1xf32> to vector<16x256xf32>
    %17 = arith.mulf %14, %16 : vector<16x256xf32>
    %18 = vector.extract_strided_slice %17 {offsets = [0, 0], sizes = [16, 128], strides = [1, 1]} : vector<16x256xf32> to vector<16x128xf32>
    %19 = arith.truncf %18 : vector<16x128xf32> to vector<16x128xbf16>
    %c0_10 = arith.constant 0 : index
    %c0_11 = arith.constant 0 : index
    %20 = vector.load %arg5[%c0_10, %c0_11] : memref<16x128xbf16, #tpu.memory_space<vmem>>, vector<16x128xbf16>
    tpu.vector_store %arg5[%c0_10, %c0_11], %19 {strides = array<i32>} : memref<16x128xbf16, #tpu.memory_space<vmem>>, vector<16x128xbf16>,
    %21 = vector.extract_strided_slice %17 {offsets = [0, 128], sizes = [16, 128], strides = [1, 1]} : vector<16x256xf32> to vector<16x128xf32>
    %22 = arith.truncf %21 : vector<16x128xf32> to vector<16x128xbf16>
    %c0_12 = arith.constant 0 : index
    %c0_13 = arith.constant 0 : index
    %23 = vector.load %arg6[%c0_12, %c0_13] : memref<16x128xbf16, #tpu.memory_space<vmem>>, vector<16x128xbf16>
    tpu.vector_store %arg6[%c0_12, %c0_13], %22 {strides = array<i32>} : memref<16x128xbf16, #tpu.memory_space<vmem>>, vector<16x128xbf16>,
    %24 = vector.extract_strided_slice %13 {offsets = [0, 256], sizes = [16, 128], strides = [1, 1]} : vector<16x512xf32> to vector<16x128xf32>
    %c0_14 = arith.constant 0 : index
    %c0_15 = arith.constant 0 : index
    %25 = vector.load %arg7[%c0_14, %c0_15] : memref<16x128xf32, #tpu.memory_space<vmem>>, vector<16x128xf32>
    tpu.vector_store %arg7[%c0_14, %c0_15], %24 {strides = array<i32>} : memref<16x128xf32, #tpu.memory_space<vmem>>, vector<16x128xf32>,
    %26 = vector.extract_strided_slice %13 {offsets = [0, 384], sizes = [16, 128], strides = [1, 1]} : vector<16x512xf32> to vector<16x128xf32>
    %c0_16 = arith.constant 0 : index
    %c0_17 = arith.constant 0 : index
    %27 = vector.load %arg8[%c0_16, %c0_17] : memref<16x128xf32, #tpu.memory_space<vmem>>, vector<16x128xf32>
    tpu.vector_store %arg8[%c0_16, %c0_17], %26 {strides = array<i32>} : memref<16x128xf32, #tpu.memory_space<vmem>>, vector<16x128xf32>,
    return
  }
  func.func @transform_0(%arg0: i32) -> (i32, i32) {
    %c0_i32 = arith.constant 0 : i32
    %c0_i32_0 = arith.constant 0 : i32
    return %arg0, %c0_i32 : i32, i32
  }
  func.func @transform_1(%arg0: i32) -> (i32, i32) {
    %c0_i32 = arith.constant 0 : i32
    %c0_i32_0 = arith.constant 0 : i32
    %c0_i32_1 = arith.constant 0 : i32
    return %c0_i32, %c0_i32_0 : i32, i32
  }
  func.func @transform_2(%arg0: i32) -> (i32, i32) {
    %c0_i32 = arith.constant 0 : i32
    %c0_i32_0 = arith.constant 0 : i32
    %c0_i32_1 = arith.constant 0 : i32
    return %c0_i32, %c0_i32_0 : i32, i32
  }
  func.func @transform_3(%arg0: i32) -> (i32, i32) {
    %c0_i32 = arith.constant 0 : i32
    %c0_i32_0 = arith.constant 0 : i32
    return %arg0, %c0_i32 : i32, i32
  }
  func.func @transform_4(%arg0: i32) -> (i32, i32) {
    %c0_i32 = arith.constant 0 : i32
    %c0_i32_0 = arith.constant 0 : i32
    return %arg0, %c0_i32 : i32, i32
  }
  func.func @transform_5(%arg0: i32) -> (i32, i32) {
    %c0_i32 = arith.constant 0 : i32
    %c0_i32_0 = arith.constant 0 : i32
    return %arg0, %c0_i32 : i32, i32
  }
  func.func @transform_6(%arg0: i32) -> (i32, i32) {
    %c0_i32 = arith.constant 0 : i32
    %c0_i32_0 = arith.constant 0 : i32
    return %arg0, %c0_i32 : i32, i32
  }
  func.func @transform_7(%arg0: i32) -> (i32, i32) {
    %c0_i32 = arith.constant 0 : i32
    %c0_i32_0 = arith.constant 0 : i32
    return %arg0, %c0_i32 : i32, i32
  }
}

</mosaic_0001>

<bundles_post_ra>
// kernel: tpu_custom_call.1
= control target key start
LH: loop header
LB: loop body
LE: loop exit
PB: predicated region body
PF: predicated region fallthrough
CT: control target
= control target key end

     0   :  { %13 = vsyncpa [#allocation3], 0  ;;  %s785_s0 = inlined_call_operand.vmem [shape: bf16[16,64], index: 0, kind: input, shape index: {}]   ;;  %s786_s1 = inlined_call_operand.hbm [shape: bf16[64,512], index: 1, kind: input, shape index: {}]   ;;  %s787_s2 = inlined_call_operand.vmem [shape: f32[1,512], index: 2, kind: input, shape index: {}]   ;;  %s788_s3 = inlined_call_operand.vmem [shape: f32[16,1], index: 3, kind: input, shape index: {}]   ;;  %s789_s4 = inlined_call_operand.hbm [shape: bf16[16,128], index: 4, kind: output, shape index: {0}]   ;;  %s790_s5 = inlined_call_operand.hbm [shape: bf16[16,128], index: 5, kind: output, shape index: {1}]   ;;  %s791_s6 = inlined_call_operand.hbm [shape: f32[16,128], index: 6, kind: output, shape index: {2}]   ;;  %s792_s7 = inlined_call_operand.hbm [shape: f32[16,128], index: 7, kind: output, shape index: {3}]  }
   0x1   :  { %14 = vsyncpa [#allocation4], 0 }
   0x2   :  { %15 = vsyncpa [#allocation7], 0 }
   0x3   :  { %16 = vsyncpa [#allocation10], 0  ;;  %s623_s24 = smov [#allocation2]   ;;  %s505_s28 = scalar_lea.hbm %s786_s1, 2048 }
   0x4   :  { %s24_s25 = sshll.u32 %s623_s24, 4  ;;  %p506_p0 = scmp.ne.s32.totalorder %s786_s1, %s505_s28  ;;  %s25_s25 = int_to_ptr.vmem [resolvable:$true] %s24_s25 }
   0x5   :  { %p509_p1 = scmp.lt.u32.totalorder %s505_s28, %s786_s1 }
   0x7   :  { %p511_p2 = pnand %p509_p1, %p506_p0 }
   0x9   :  { %514 = shalt.err (!%p511_p2)
}
   0xa   :  { %s515_s10 = scalar_lea.vmem %s25_s25, 2048  ;;  %p520_p4 = scmp.lt.s32.totalorder %s25_s25, %s25_s25 }
   0xb   :  { %p516_p3 = scmp.ne.s32.totalorder %s25_s25, %s515_s10  ;;  %p521_p5 = scmp.lt.s32.totalorder %s515_s10, %s515_s10 }
   0xd   :  { %p522_p6 = por %p521_p5, %p520_p4 }
   0xf   :  { %p523_p7 = pnand %p522_p6, %p516_p3 }
  0x11   :  { %526 = shalt.err (!%p523_p7)
}
  0x12   :  { %s624_s11 = smov 256   ;;  %s625_s12 = smov 16  }
  0x13   :  { %30 = dma.hbm_to_vmem [thread:$0]  %s786_s1, 2048, %s25_s25, [#allocation3], %s624_s11, %s624_s11, %s625_s12  }
  0x14   :  { %615 = dma.done.wait [#allocation3], 2048  }
  0x15   :  { %616 = vsyncadd [#allocation3], 4294965248  ;;  %v626_v0 = vmov 0   ;;  %v464_v1 = vld [vmem:[#allocation2 + $0x4] ss:$16 sps:$4 sm:$0xff]   ;;  %v303_v19 = vld [vmem:[%s788_s3 + $0x8] sm:$0xff]  ;;  %v59_v20 = vlaneseq }
  0x16   :  { %200 = vmatprep.mubr.bf16.mxu0 %v626_v0  ;;  %243 = vmatprep.mubr.bf16.mxu1 %v626_v0  ;;  %v466_v2 = vld [vmem:[#allocation2 + $0xc] ss:$16 sps:$4 sm:$0xff]   ;;  %v468_v3 = vld [vmem:[#allocation2] ss:$16 sps:$4 sm:$0xff]   ;;  %v469_v4 = vld [vmem:[#allocation2 + $0x8] ss:$16 sps:$4 sm:$0xff]  }
  0x17   :  { %463 = vset.pattern.permute.xlu0 %v626_v0  ;;  %168 = vmatprep.subr.bf16.mxu0 %v464_v1  ;;  %v470_v5 = vld [vmem:[#allocation2 + $0x24] ss:$16 sps:$4 sm:$0xff]   ;;  %v472_v6 = vld [vmem:[#allocation2 + $0x2c] ss:$16 sps:$4 sm:$0xff]   ;;  %v474_v7 = vld [vmem:[#allocation2 + $0x20] ss:$16 sps:$4 sm:$0xff]  }
  0x18   :  { %211 = vmatprep.subr.bf16.mxu1 %v466_v2  ;;  %169 = vmatpush1.bf16.msra.mxu0 %v468_v3  ;;  %v475_v8 = vld [vmem:[#allocation2 + $0x28] ss:$16 sps:$4 sm:$0xff]   ;;  %v476_v9 = vld [vmem:[#allocation2 + $0x44] ss:$16 sps:$4 sm:$0xff]   ;;  %v478_v10 = vld [vmem:[#allocation2 + $0x4c] ss:$16 sps:$4 sm:$0xff]  }
  0x19   :  { %212 = vmatpush1.bf16.msra.mxu1 %v469_v4  ;;  %170 = vmatprep.subr.bf16.mxu0 %v470_v5  ;;  %v480_v11 = vld [vmem:[#allocation2 + $0x40] ss:$16 sps:$4 sm:$0xff]   ;;  %v481_v12 = vld [vmem:[#allocation2 + $0x48] ss:$16 sps:$4 sm:$0xff]   ;;  %v482_v13 = vld [vmem:[#allocation2 + $0x64] ss:$16 sps:$4 sm:$0xff]  }
  0x1a   :  { %213 = vmatprep.subr.bf16.mxu1 %v472_v6  ;;  %v484_v14 = vld [vmem:[#allocation2 + $0x6c] ss:$16 sps:$4 sm:$0xff]   ;;  %v302_v15 = vld [vmem:[%s788_s3] sm:$0xff]  ;;  %v487_v17 = vld [vmem:[#allocation2 + $0x68] ss:$16 sps:$4 sm:$0xff]   ;;  %vm164_vm0 = vcmask 523264  }
  0x1b   :  { %v486_v16 = vld [vmem:[#allocation2 + $0x60] ss:$16 sps:$4 sm:$0xff]   ;;  %306 = vperm.xlu0 %463, %v302_v15   ;;  %v60_v21 = vshrl.u32 %v59_v20, 7  ;;  %s628_s3 = smov [#allocation6]   ;;  %s629_s23 = smov [#allocation5]  }
  0x1c   :  { %171 = vmatpush1.bf16.msra.mxu0 %v474_v7  ;;  %v488_v18 = vld [vmem:[%s785_s0] sm:$0xff]   ;;  %s627_s0 = smov [#allocation9]   ;;  %s359_s22 = sshll.u32 %s628_s3, 4  ;;  %s712_s22 = int_to_ptr.vmem [resolvable:$true] %s359_s22 }
  0x1d   :  { %214 = vmatpush1.bf16.msra.mxu1 %v475_v8  ;;  %172 = vmatprep.subr.bf16.mxu0 %v476_v9  ;;  %v61_v22 = vsub.s32 0, %v60_v21  ;;  %v69_v23 = vsub.s32 2, %v60_v21  ;;  %v57_v24 = vld [vmem:[%s787_s2] sm:$0xf]  ;;  %v65_v25 = vsub.s32 1, %v60_v21  ;;  %v73_v26 = vsub.s32 3, %v60_v21 }
  0x1e   :  { %215 = vmatprep.subr.bf16.mxu1 %v478_v10  ;;  %s383_s2 = sshll.u32 %s627_s0, 4  ;;  %s347_s24 = sshll.u32 %s629_s23, 4  ;;  %s384_s2 = int_to_ptr.vmem [resolvable:$true] %s383_s2  ;;  %s710_s24 = int_to_ptr.vmem [resolvable:$true] %s347_s24 }
  0x1f   :  { %311 = vperm.xlu0 %463, %v303_v19   ;;  %v62_v27 = vrot.slane %v57_v24, %v61_v22  ;;  %v70_v28 = vrot.slane %v57_v24, %v69_v23  ;;  %v66_v29 = vrot.slane %v57_v24, %v65_v25  ;;  %v74_v30 = vrot.slane %v57_v24, %v73_v26  ;;  %s630_s25 = smov [#allocation8]   ;;  %s527_s27 = scalar_lea.vmem %s384_s2, 256 }
  0x20   :  { %173 = vmatpush1.bf16.msra.mxu0 %v480_v11  ;;  %s371_s26 = sshll.u32 %s630_s25, 4  ;;  %p528_p8 = scmp.ne.s32.totalorder %s384_s2, %s527_s27  ;;  %s714_s26 = int_to_ptr.vmem [resolvable:$true] %s371_s26 }
  0x21   :  { %216 = vmatpush1.bf16.msra.mxu1 %v481_v12  ;;  %174 = vmatprep.subr.bf16.mxu0 %v482_v13  ;;  %p532_p9 = scmp.lt.s32.totalorder %s384_s2, %s384_s2  ;;  %p533_p10 = scmp.lt.s32.totalorder %s527_s27, %s527_s27 }
  0x22   :  { %217 = vmatprep.subr.bf16.mxu1 %v484_v14 }
  0x23   :  { %p534_p11 = por %p533_p10, %p532_p9 }
  0x24   :  { %175 = vmatpush1.bf16.msra.mxu0 %v486_v16 }
  0x25   :  { %218 = vmatpush1.bf16.msra.mxu1 %v487_v17  ;;  %p535_p12 = pnand %p534_p11, %p528_p8 }
  0x27   :  { %423 = vmatmul.mubr.msk.bf16.vlgmr.msra.gmra.mrb[0].mxu0 %vm164_vm0, %v488_v18 }
  0x28   :  { %424 = vmatmul.mubr.msk.bf16.vlgmr.msra.gmra.mrb[0].mxu1 %vm164_vm0, %v488_v18 }
  0x9a   :  { %v307_v1 = vpop.permute.xlu0 %306 }
  0x9e   :  { %v312_v18 = vpop.permute.xlu0 %311 }
  0xfa   :  { %v202_v31 = vpop.f32.mrb[0].mxu0 }
  0xfb   :  { %v245_v32 = vpop.f32.mrb[0].mxu1  ;;  %v203_v33 = vadd.f32 %v202_v31, %v62_v27  ;;  %v204_v35 = vpop.f32.mrb[1].mxu0 }
  0xfc   :  { %v246_v34 = vadd.f32 %v245_v32, %v70_v28  ;;  %v247_v36 = vpop.f32.mrb[1].mxu1  ;;  %v699_v37 = vadd.f32 %v204_v35, %v66_v29  ;;  %v206_v39 = vpop.f32.mrb[2].mxu0 }
  0xfd   :  { %v248_v38 = vadd.f32 %v247_v36, %v74_v30  ;;  %v249_v40 = vpop.f32.mrb[2].mxu1  ;;  %v262_v41 = vmin.f32 %v203_v33, 0.0  ;;  %v207_v43 = vadd.f32 %v206_v39, %v62_v27  ;;  %v208_v44 = vpop.f32.mrb[3].mxu0  ;;  %vm254_vm2 = vcmp.gt.f32.partialorder %v203_v33, 0.0 }
  0xfe   :  { %v264_v42 = vmin.f32 %v246_v34, 0.0  ;;  %v251_v45 = vpop.f32.mrb[3].mxu1  ;;  %v263_v46 = vmin.f32 %v699_v37, 0.0  ;;  %v250_v48 = vadd.f32 %v249_v40, %v70_v28  ;;  %v702_v52 = vadd.f32 %v208_v44, %v66_v29 }
  0xff   :  { %v265_v47 = vmin.f32 %v248_v38, 0.0  ;;  %v270_v49 = vmul.f32 1.442695, %v262_v41  ;;  %v266_v51 = vmin.f32 %v207_v43, 0.0  ;;  %v252_v58 = vadd.f32 %v251_v45, %v74_v30 }
 0x100   :  { %v274_v50 = vmul.f32 1.442695, %v264_v42  ;;  %v272_v53 = vmul.f32 1.442695, %v263_v46  ;;  %v268_v55 = vmin.f32 %v250_v48, 0.0  ;;  %v267_v57 = vmin.f32 %v702_v52, 0.0 }
 0x101   :  { %v276_v54 = vmul.f32 1.442695, %v265_v47  ;;  %489 = vpow2.f32 %v270_v49  ;;  %v278_v56 = vmul.f32 1.442695, %v266_v51  ;;  %v269_v61 = vmin.f32 %v252_v58, 0.0 }
 0x102   :  { %491 = vpow2.f32 %v274_v50  ;;  %v282_v59 = vmul.f32 1.442695, %v268_v55  ;;  %v280_v60 = vmul.f32 1.442695, %v267_v57  ;;  %vm256_vm1 = vcmp.gt.f32.partialorder %v246_v34, 0.0 }
 0x103   :  { %493 = vpow2.f32 %v272_v53  ;;  %v284_v62 = vmul.f32 1.442695, %v269_v61  ;;  %vm257_vm3 = vcmp.gt.f32.partialorder %v248_v38, 0.0  ;;  %vm260_vm4 = vcmp.gt.f32.partialorder %v250_v48, 0.0 }
 0x104   :  { %495 = vpow2.f32 %v276_v54  ;;  %vm255_vm5 = vcmp.gt.f32.partialorder %v699_v37, 0.0  ;;  %vm258_vm6 = vcmp.gt.f32.partialorder %v207_v43, 0.0  ;;  %vm259_vm7 = vcmp.gt.f32.partialorder %v702_v52, 0.0 }
 0x105   :  { %497 = vpow2.f32 %v278_v56  ;;  %vm261_vm8 = vcmp.gt.f32.partialorder %v252_v58, 0.0 }
 0x106   :  { %499 = vpow2.f32 %v282_v59 }
 0x107   :  { %501 = vpow2.f32 %v280_v60 }
 0x108   :  { %503 = vpow2.f32 %v284_v62 }
 0x10b   :  { %v490_v63 = vpop.eup %489 }
 0x10c   :  { %v492_v0 = vpop.eup %491  ;;  %v425_v2 = vadd.f32 -1.0, %v490_v63 }
 0x10d   :  { %v494_v3 = vpop.eup %493  ;;  %v427_v4 = vadd.f32 -1.0, %v492_v0 }
 0x10e   :  { %v496_v5 = vpop.eup %495  ;;  %v426_v6 = vadd.f32 -1.0, %v494_v3  ;;  %v294_v11 = vsel %vm254_vm2, %v203_v33, %v425_v2 }
 0x10f   :  { %v498_v7 = vpop.eup %497  ;;  %v296_v8 = vsel %vm256_vm1, %v246_v34, %v427_v4  ;;  %v428_v9 = vadd.f32 -1.0, %v496_v5  ;;  %v314_v23 = vmul.f32 %v307_v1, %v294_v11 }
 0x110   :  { %v500_v10 = vpop.eup %499  ;;  %338 = vst [vmem:[#allocation8] sm:$0xff] %v296_v8  ;;  %v429_v12 = vadd.f32 -1.0, %v498_v7  ;;  %v295_v17 = vsel %vm255_vm5, %v699_v37, %v426_v6 }
 0x111   :  { %v502_v13 = vpop.eup %501  ;;  %v297_v14 = vsel %vm257_vm3, %v248_v38, %v428_v9  ;;  %v431_v15 = vadd.f32 -1.0, %v500_v10  ;;  %v315_v27 = vmul.f32 %v307_v1, %v295_v17 }
 0x112   :  { %v504_v16 = vpop.eup %503  ;;  %340 = vst [vmem:[#allocation9] sm:$0xff] %v297_v14  ;;  %v430_v19 = vadd.f32 -1.0, %v502_v13  ;;  %v298_v20 = vsel %vm258_vm6, %v207_v43, %v429_v12 }
 0x113   :  { %v300_v21 = vsel %vm260_vm4, %v250_v48, %v431_v15  ;;  %v432_v22 = vadd.f32 -1.0, %v504_v16  ;;  %v316_v24 = vmul.f32 %v312_v18, %v298_v20 }
 0x114   :  { %339 = vst [vmem:[#allocation8 + $0x8] sm:$0xff] %v300_v21  ;;  %v299_v25 = vsel %vm259_vm7, %v702_v52, %v430_v19 }
 0x115   :  { %v301_v26 = vsel %vm261_vm8, %v252_v58, %v432_v22  ;;  %v317_v28 = vmul.f32 %v312_v18, %v299_v25  ;;  %v444_v29 = vpack.c.bf16 %v316_v24, %v314_v23 }
 0x116   :  { %341 = vst [vmem:[#allocation9 + $0x8] sm:$0xff] %v301_v26 }
 0x117   :  { %445 = vst [vmem:[#allocation5] sm:$0xff] %v444_v29   ;;  %v449_v30 = vpack.c.bf16 %v317_v28, %v315_v27 }
 0x118   :  { %538 = shalt.err (!%p535_p12)
}
 0x119   :  { %s539_s30 = scalar_lea.hbm %s792_s7, 256 }
 0x11a   :  { %p540_p13 = scmp.ne.s32.totalorder %s792_s7, %s539_s30  ;;  %p543_p0 = scmp.lt.u32.totalorder %s539_s30, %s792_s7 }
 0x11c   :  { %p545_p1 = pnand %p543_p0, %p540_p13 }
 0x11e   :  { %548 = shalt.err (!%p545_p1)
}
 0x11f   :  { %s631_s12 = smov 128   ;;  %s632_s13 = smov 8  }
 0x120   :  { %389 = dma.vmem_to_hbm [thread:$0]  %s384_s2, 256, %s792_s7, [#allocation10], %s631_s12, %s631_s12, %s632_s13  }
 0x121   :  { %s549_s15 = scalar_lea.vmem %s710_s24, 128  ;;  %p554_p3 = scmp.lt.s32.totalorder %s710_s24, %s710_s24 }
 0x122   :  { %p550_p2 = scmp.ne.s32.totalorder %s710_s24, %s549_s15  ;;  %p555_p4 = scmp.lt.s32.totalorder %s549_s15, %s549_s15 }
 0x124   :  { %p556_p5 = por %p555_p4, %p554_p3 }
 0x126   :  { %p557_p6 = pnand %p556_p5, %p550_p2 }
 0x128   :  { %560 = shalt.err (!%p557_p6)
}
 0x129   :  { %s561_s18 = scalar_lea.hbm %s789_s4, 128 }
 0x12a   :  { %p562_p7 = scmp.ne.s32.totalorder %s789_s4, %s561_s18  ;;  %p565_p8 = scmp.lt.u32.totalorder %s561_s18, %s789_s4 }
 0x12c   :  { %p567_p9 = pnand %p565_p8, %p562_p7 }
 0x12e   :  { %570 = shalt.err (!%p567_p9)
}
 0x12f   :  { %s633_s7 = smov 64   ;;  %s634_s2 = smov 4   ;;  %450 = vst [vmem:[#allocation6] sm:$0xff] %v449_v30  }
 0x130   :  { %353 = dma.vmem_to_hbm [thread:$0]  %s710_s24, 128, %s789_s4, [#allocation4], %s633_s7, %s633_s7, %s634_s2  }
 0x131   :  { %s571_s25 = scalar_lea.vmem %s712_s22, 128  ;;  %p576_p11 = scmp.lt.s32.totalorder %s712_s22, %s712_s22 }
 0x132   :  { %p572_p10 = scmp.ne.s32.totalorder %s712_s22, %s571_s25  ;;  %p577_p12 = scmp.lt.s32.totalorder %s571_s25, %s571_s25 }
 0x134   :  { %p578_p13 = por %p577_p12, %p576_p11 }
 0x136   :  { %p579_p0 = pnand %p578_p13, %p572_p10 }
 0x138   :  { %582 = shalt.err (!%p579_p0)
}
 0x139   :  { %s583_s29 = scalar_lea.hbm %s790_s5, 128 }
 0x13a   :  { %p584_p1 = scmp.ne.s32.totalorder %s790_s5, %s583_s29  ;;  %p587_p2 = scmp.lt.u32.totalorder %s583_s29, %s790_s5 }
 0x13c   :  { %p589_p3 = pnand %p587_p2, %p584_p1 }
 0x13e   :  { %592 = shalt.err (!%p589_p3)
}
 0x13f   :  { %365 = dma.vmem_to_hbm [thread:$0]  %s712_s22, 128, %s790_s5, [#allocation7], %s633_s7, %s633_s7, %s634_s2  }
 0x140   :  { %s593_s11 = scalar_lea.vmem %s714_s26, 256  ;;  %p598_p5 = scmp.lt.s32.totalorder %s714_s26, %s714_s26 }
 0x141   :  { %p594_p4 = scmp.ne.s32.totalorder %s714_s26, %s593_s11  ;;  %p599_p6 = scmp.lt.s32.totalorder %s593_s11, %s593_s11 }
 0x143   :  { %p600_p7 = por %p599_p6, %p598_p5 }
 0x145   :  { %p601_p8 = pnand %p600_p7, %p594_p4 }
 0x147   :  { %604 = shalt.err (!%p601_p8)
}
 0x148   :  { %s605_s15 = scalar_lea.hbm %s791_s6, 256 }
 0x149   :  { %p606_p9 = scmp.ne.s32.totalorder %s791_s6, %s605_s15  ;;  %p609_p10 = scmp.lt.u32.totalorder %s605_s15, %s791_s6 }
 0x14b   :  { %p611_p11 = pnand %p609_p10, %p606_p9 }
 0x14d   :  { %614 = shalt.err (!%p611_p11)
}
 0x14e   :  { %377 = dma.vmem_to_hbm [thread:$0]  %s714_s26, 256, %s791_s6, [#allocation7], %s631_s12, %s631_s12, %s632_s13  }
 0x14f   :  { %617 = dma.done.wait [#allocation4], 128  }
 0x150   :  { %618 = vsyncadd [#allocation4], 4294967168 }
 0x151   :  { %619 = dma.done.wait [#allocation7], 384  }
 0x152   :  { %620 = vsyncadd [#allocation7], 4294966912 }
 0x153   :  { %621 = dma.done.wait [#allocation10], 256  }
 0x154   :  { %622 = vsyncadd [#allocation10], 4294967040 }
 0x155   :  { %402 = vsyncpa [#allocation3], 1 }
 0x156   :  { %403 = vsyncpa [#allocation4], 1 }
 0x157   :  { %404 = vsyncpa [#allocation7], 1 }
 0x158   :  { %405 = vsyncpa [#allocation10], 1 }

// kernel: tpu_custom_call.1
= control target key start
LH: loop header
LB: loop body
LE: loop exit
PB: predicated region body
PF: predicated region fallthrough
CT: control target
= control target key end

     0   :  { %13 = vsyncpa [#allocation3], 0  ;;  %s785_s0 = inlined_call_operand.vmem [shape: bf16[16,64], index: 0, kind: input, shape index: {}]   ;;  %s786_s1 = inlined_call_operand.hbm [shape: bf16[64,512], index: 1, kind: input, shape index: {}]   ;;  %s787_s2 = inlined_call_operand.vmem [shape: f32[1,512], index: 2, kind: input, shape index: {}]   ;;  %s788_s3 = inlined_call_operand.vmem [shape: f32[16,1], index: 3, kind: input, shape index: {}]   ;;  %s789_s4 = inlined_call_operand.hbm [shape: bf16[16,128], index: 4, kind: output, shape index: {0}]   ;;  %s790_s5 = inlined_call_operand.hbm [shape: bf16[16,128], index: 5, kind: output, shape index: {1}]   ;;  %s791_s6 = inlined_call_operand.hbm [shape: f32[16,128], index: 6, kind: output, shape index: {2}]   ;;  %s792_s7 = inlined_call_operand.hbm [shape: f32[16,128], index: 7, kind: output, shape index: {3}]  }
   0x1   :  { %14 = vsyncpa [#allocation4], 0 }
   0x2   :  { %15 = vsyncpa [#allocation7], 0 }
   0x3   :  { %16 = vsyncpa [#allocation10], 0  ;;  %s623_s24 = smov [#allocation2]   ;;  %s505_s28 = scalar_lea.hbm %s786_s1, 2048 }
   0x4   :  { %s24_s25 = sshll.u32 %s623_s24, 4  ;;  %p506_p0 = scmp.ne.s32.totalorder %s786_s1, %s505_s28  ;;  %s25_s25 = int_to_ptr.vmem [resolvable:$true] %s24_s25 }
   0x5   :  { %p509_p1 = scmp.lt.u32.totalorder %s505_s28, %s786_s1 }
   0x7   :  { %p511_p2 = pnand %p509_p1, %p506_p0 }
   0x9   :  { %514 = shalt.err (!%p511_p2)
}
   0xa   :  { %s515_s10 = scalar_lea.vmem %s25_s25, 2048  ;;  %p520_p4 = scmp.lt.s32.totalorder %s25_s25, %s25_s25 }
   0xb   :  { %p516_p3 = scmp.ne.s32.totalorder %s25_s25, %s515_s10  ;;  %p521_p5 = scmp.lt.s32.totalorder %s515_s10, %s515_s10 }
   0xd   :  { %p522_p6 = por %p521_p5, %p520_p4 }
   0xf   :  { %p523_p7 = pnand %p522_p6, %p516_p3 }
  0x11   :  { %526 = shalt.err (!%p523_p7)
}
  0x12   :  { %s624_s11 = smov 256   ;;  %s625_s12 = smov 16  }
  0x13   :  { %30 = dma.hbm_to_vmem [thread:$0]  %s786_s1, 2048, %s25_s25, [#allocation3], %s624_s11, %s624_s11, %s625_s12  }
  0x14   :  { %615 = dma.done.wait [#allocation3], 2048  }
  0x15   :  { %616 = vsyncadd [#allocation3], 4294965248  ;;  %v626_v0 = vmov 0   ;;  %v464_v1 = vld [vmem:[#allocation2 + $0x4] ss:$16 sps:$4 sm:$0xff]   ;;  %v303_v19 = vld [vmem:[%s788_s3 + $0x8] sm:$0xff]  ;;  %v59_v20 = vlaneseq }
  0x16   :  { %200 = vmatprep.mubr.bf16.mxu0 %v626_v0  ;;  %243 = vmatprep.mubr.bf16.mxu1 %v626_v0  ;;  %v466_v2 = vld [vmem:[#allocation2 + $0xc] ss:$16 sps:$4 sm:$0xff]   ;;  %v468_v3 = vld [vmem:[#allocation2] ss:$16 sps:$4 sm:$0xff]   ;;  %v469_v4 = vld [vmem:[#allocation2 + $0x8] ss:$16 sps:$4 sm:$0xff]  }
  0x17   :  { %463 = vset.pattern.permute.xlu0 %v626_v0  ;;  %168 = vmatprep.subr.bf16.mxu0 %v464_v1  ;;  %v470_v5 = vld [vmem:[#allocation2 + $0x24] ss:$16 sps:$4 sm:$0xff]   ;;  %v472_v6 = vld [vmem:[#allocation2 + $0x2c] ss:$16 sps:$4 sm:$0xff]   ;;  %v474_v7 = vld [vmem:[#allocation2 + $0x20] ss:$16 sps:$4 sm:$0xff]  }
  0x18   :  { %211 = vmatprep.subr.bf16.mxu1 %v466_v2  ;;  %169 = vmatpush1.bf16.msra.mxu0 %v468_v3  ;;  %v475_v8 = vld [vmem:[#allocation2 + $0x28] ss:$16 sps:$4 sm:$0xff]   ;;  %v476_v9 = vld [vmem:[#allocation2 + $0x44] ss:$16 sps:$4 sm:$0xff]   ;;  %v478_v10 = vld [vmem:[#allocation2 + $0x4c] ss:$16 sps:$4 sm:$0xff]  }
  0x19   :  { %212 = vmatpush1.bf16.msra.mxu1 %v469_v4  ;;  %170 = vmatprep.subr.bf16.mxu0 %v470_v5  ;;  %v480_v11 = vld [vmem:[#allocation2 + $0x40] ss:$16 sps:$4 sm:$0xff]   ;;  %v481_v12 = vld [vmem:[#allocation2 + $0x48] ss:$16 sps:$4 sm:$0xff]   ;;  %v482_v13 = vld [vmem:[#allocation2 + $0x64] ss:$16 sps:$4 sm:$0xff]  }
  0x1a   :  { %213 = vmatprep.subr.bf16.mxu1 %v472_v6  ;;  %v484_v14 = vld [vmem:[#allocation2 + $0x6c] ss:$16 sps:$4 sm:$0xff]   ;;  %v302_v15 = vld [vmem:[%s788_s3] sm:$0xff]  ;;  %v487_v17 = vld [vmem:[#allocation2 + $0x68] ss:$16 sps:$4 sm:$0xff]   ;;  %vm164_vm0 = vcmask 523264  }
  0x1b   :  { %v486_v16 = vld [vmem:[#allocation2 + $0x60] ss:$16 sps:$4 sm:$0xff]   ;;  %306 = vperm.xlu0 %463, %v302_v15   ;;  %v60_v21 = vshrl.u32 %v59_v20, 7  ;;  %s628_s3 = smov [#allocation6]   ;;  %s629_s23 = smov [#allocation5]  }
  0x1c   :  { %171 = vmatpush1.bf16.msra.mxu0 %v474_v7  ;;  %v488_v18 = vld [vmem:[%s785_s0] sm:$0xff]   ;;  %s627_s0 = smov [#allocation9]   ;;  %s359_s22 = sshll.u32 %s628_s3, 4  ;;  %s712_s22 = int_to_ptr.vmem [resolvable:$true] %s359_s22 }
  0x1d   :  { %214 = vmatpush1.bf16.msra.mxu1 %v475_v8  ;;  %172 = vmatprep.subr.bf16.mxu0 %v476_v9  ;;  %v61_v22 = vsub.s32 0, %v60_v21  ;;  %v69_v23 = vsub.s32 2, %v60_v21  ;;  %v57_v24 = vld [vmem:[%s787_s2] sm:$0xf]  ;;  %v65_v25 = vsub.s32 1, %v60_v21  ;;  %v73_v26 = vsub.s32 3, %v60_v21 }
  0x1e   :  { %215 = vmatprep.subr.bf16.mxu1 %v478_v10  ;;  %s383_s2 = sshll.u32 %s627_s0, 4  ;;  %s347_s24 = sshll.u32 %s629_s23, 4  ;;  %s384_s2 = int_to_ptr.vmem [resolvable:$true] %s383_s2  ;;  %s710_s24 = int_to_ptr.vmem [resolvable:$true] %s347_s24 }
  0x1f   :  { %311 = vperm.xlu0 %463, %v303_v19   ;;  %v62_v27 = vrot.slane %v57_v24, %v61_v22  ;;  %v70_v28 = vrot.slane %v57_v24, %v69_v23  ;;  %v66_v29 = vrot.slane %v57_v24, %v65_v25  ;;  %v74_v30 = vrot.slane %v57_v24, %v73_v26  ;;  %s630_s25 = smov [#allocation8]   ;;  %s527_s27 = scalar_lea.vmem %s384_s2, 256 }
  0x20   :  { %173 = vmatpush1.bf16.msra.mxu0 %v480_v11  ;;  %s371_s26 = sshll.u32 %s630_s25, 4  ;;  %p528_p8 = scmp.ne.s32.totalorder %s384_s2, %s527_s27  ;;  %s714_s26 = int_to_ptr.vmem [resolvable:$true] %s371_s26 }
  0x21   :  { %216 = vmatpush1.bf16.msra.mxu1 %v481_v12  ;;  %174 = vmatprep.subr.bf16.mxu0 %v482_v13  ;;  %p532_p9 = scmp.lt.s32.totalorder %s384_s2, %s384_s2  ;;  %p533_p10 = scmp.lt.s32.totalorder %s527_s27, %s527_s27 }
  0x22   :  { %217 = vmatprep.subr.bf16.mxu1 %v484_v14 }
  0x23   :  { %p534_p11 = por %p533_p10, %p532_p9 }
  0x24   :  { %175 = vmatpush1.bf16.msra.mxu0 %v486_v16 }
  0x25   :  { %218 = vmatpush1.bf16.msra.mxu1 %v487_v17  ;;  %p535_p12 = pnand %p534_p11, %p528_p8 }
  0x27   :  { %423 = vmatmul.mubr.msk.bf16.vlgmr.msra.gmra.mrb[0].mxu0 %vm164_vm0, %v488_v18 }
  0x28   :  { %424 = vmatmul.mubr.msk.bf16.vlgmr.msra.gmra.mrb[0].mxu1 %vm164_vm0, %v488_v18 }
  0x9a   :  { %v307_v1 = vpop.permute.xlu0 %306 }
  0x9e   :  { %v312_v18 = vpop.permute.xlu0 %311 }
  0xfa   :  { %v202_v31 = vpop.f32.mrb[0].mxu0 }
  0xfb   :  { %v245_v32 = vpop.f32.mrb[0].mxu1  ;;  %v203_v33 = vadd.f32 %v202_v31, %v62_v27  ;;  %v204_v35 = vpop.f32.mrb[1].mxu0 }
  0xfc   :  { %v246_v34 = vadd.f32 %v245_v32, %v70_v28  ;;  %v247_v36 = vpop.f32.mrb[1].mxu1  ;;  %v699_v37 = vadd.f32 %v204_v35, %v66_v29  ;;  %v206_v39 = vpop.f32.mrb[2].mxu0 }
  0xfd   :  { %v248_v38 = vadd.f32 %v247_v36, %v74_v30  ;;  %v249_v40 = vpop.f32.mrb[2].mxu1  ;;  %v262_v41 = vmin.f32 %v203_v33, 0.0  ;;  %v207_v43 = vadd.f32 %v206_v39, %v62_v27  ;;  %v208_v44 = vpop.f32.mrb[3].mxu0  ;;  %vm254_vm2 = vcmp.gt.f32.partialorder %v203_v33, 0.0 }
  0xfe   :  { %v264_v42 = vmin.f32 %v246_v34, 0.0  ;;  %v251_v45 = vpop.f32.mrb[3].mxu1  ;;  %v263_v46 = vmin.f32 %v699_v37, 0.0  ;;  %v250_v48 = vadd.f32 %v249_v40, %v70_v28  ;;  %v702_v52 = vadd.f32 %v208_v44, %v66_v29 }
  0xff   :  { %v265_v47 = vmin.f32 %v248_v38, 0.0  ;;  %v270_v49 = vmul.f32 1.442695, %v262_v41  ;;  %v266_v51 = vmin.f32 %v207_v43, 0.0  ;;  %v252_v58 = vadd.f32 %v251_v45, %v74_v30 }
 0x100   :  { %v274_v50 = vmul.f32 1.442695, %v264_v42  ;;  %v272_v53 = vmul.f32 1.442695, %v263_v46  ;;  %v268_v55 = vmin.f32 %v250_v48, 0.0  ;;  %v267_v57 = vmin.f32 %v702_v52, 0.0 }
 0x101   :  { %v276_v54 = vmul.f32 1.442695, %v265_v47  ;;  %489 = vpow2.f32 %v270_v49  ;;  %v278_v56 = vmul.f32 1.442695, %v266_v51  ;;  %v269_v61 = vmin.f32 %v252_v58, 0.0 }
 0x102   :  { %491 = vpow2.f32 %v274_v50  ;;  %v282_v59 = vmul.f32 1.442695, %v268_v55  ;;  %v280_v60 = vmul.f32 1.442695, %v267_v57  ;;  %vm256_vm1 = vcmp.gt.f32.partialorder %v246_v34, 0.0 }
 0x103   :  { %493 = vpow2.f32 %v272_v53  ;;  %v284_v62 = vmul.f32 1.442695, %v269_v61  ;;  %vm257_vm3 = vcmp.gt.f32.partialorder %v248_v38, 0.0  ;;  %vm260_vm4 = vcmp.gt.f32.partialorder %v250_v48, 0.0 }
 0x104   :  { %495 = vpow2.f32 %v276_v54  ;;  %vm255_vm5 = vcmp.gt.f32.partialorder %v699_v37, 0.0  ;;  %vm258_vm6 = vcmp.gt.f32.partialorder %v207_v43, 0.0  ;;  %vm259_vm7 = vcmp.gt.f32.partialorder %v702_v52, 0.0 }
 0x105   :  { %497 = vpow2.f32 %v278_v56  ;;  %vm261_vm8 = vcmp.gt.f32.partialorder %v252_v58, 0.0 }
 0x106   :  { %499 = vpow2.f32 %v282_v59 }
 0x107   :  { %501 = vpow2.f32 %v280_v60 }
 0x108   :  { %503 = vpow2.f32 %v284_v62 }
 0x10b   :  { %v490_v63 = vpop.eup %489 }
 0x10c   :  { %v492_v0 = vpop.eup %491  ;;  %v425_v2 = vadd.f32 -1.0, %v490_v63 }
 0x10d   :  { %v494_v3 = vpop.eup %493  ;;  %v427_v4 = vadd.f32 -1.0, %v492_v0 }
 0x10e   :  { %v496_v5 = vpop.eup %495  ;;  %v426_v6 = vadd.f32 -1.0, %v494_v3  ;;  %v294_v11 = vsel %vm254_vm2, %v203_v33, %v425_v2 }
 0x10f   :  { %v498_v7 = vpop.eup %497  ;;  %v296_v8 = vsel %vm256_vm1, %v246_v34, %v427_v4  ;;  %v428_v9 = vadd.f32 -1.0, %v496_v5  ;;  %v314_v23 = vmul.f32 %v307_v1, %v294_v11 }
 0x110   :  { %v500_v10 = vpop.eup %499  ;;  %338 = vst [vmem:[#allocation8] sm:$0xff] %v296_v8  ;;  %v429_v12 = vadd.f32 -1.0, %v498_v7  ;;  %v295_v17 = vsel %vm255_vm5, %v699_v37, %v426_v6 }
 0x111   :  { %v502_v13 = vpop.eup %501  ;;  %v297_v14 = vsel %vm257_vm3, %v248_v38, %v428_v9  ;;  %v431_v15 = vadd.f32 -1.0, %v500_v10  ;;  %v315_v27 = vmul.f32 %v307_v1, %v295_v17 }
 0x112   :  { %v504_v16 = vpop.eup %503  ;;  %340 = vst [vmem:[#allocation9] sm:$0xff] %v297_v14  ;;  %v430_v19 = vadd.f32 -1.0, %v502_v13  ;;  %v298_v20 = vsel %vm258_vm6, %v207_v43, %v429_v12 }
 0x113   :  { %v300_v21 = vsel %vm260_vm4, %v250_v48, %v431_v15  ;;  %v432_v22 = vadd.f32 -1.0, %v504_v16  ;;  %v316_v24 = vmul.f32 %v312_v18, %v298_v20 }
 0x114   :  { %339 = vst [vmem:[#allocation8 + $0x8] sm:$0xff] %v300_v21  ;;  %v299_v25 = vsel %vm259_vm7, %v702_v52, %v430_v19 }
 0x115   :  { %v301_v26 = vsel %vm261_vm8, %v252_v58, %v432_v22  ;;  %v317_v28 = vmul.f32 %v312_v18, %v299_v25  ;;  %v444_v29 = vpack.c.bf16 %v316_v24, %v314_v23 }
 0x116   :  { %341 = vst [vmem:[#allocation9 + $0x8] sm:$0xff] %v301_v26 }
 0x117   :  { %445 = vst [vmem:[#allocation5] sm:$0xff] %v444_v29   ;;  %v449_v30 = vpack.c.bf16 %v317_v28, %v315_v27 }
 0x118   :  { %538 = shalt.err (!%p535_p12)
}
 0x119   :  { %s539_s30 = scalar_lea.hbm %s792_s7, 256 }
 0x11a   :  { %p540_p13 = scmp.ne.s32.totalorder %s792_s7, %s539_s30  ;;  %p543_p0 = scmp.lt.u32.totalorder %s539_s30, %s792_s7 }
 0x11c   :  { %p545_p1 = pnand %p543_p0, %p540_p13 }
 0x11e   :  { %548 = shalt.err (!%p545_p1)
}
 0x11f   :  { %s631_s12 = smov 128   ;;  %s632_s13 = smov 8  }
 0x120   :  { %389 = dma.vmem_to_hbm [thread:$0]  %s384_s2, 256, %s792_s7, [#allocation10], %s631_s12, %s631_s12, %s632_s13  }
 0x121   :  { %s549_s15 = scalar_lea.vmem %s710_s24, 128  ;;  %p554_p3 = scmp.lt.s32.totalorder %s710_s24, %s710_s24 }
 0x122   :  { %p550_p2 = scmp.ne.s32.totalorder %s710_s24, %s549_s15  ;;  %p555_p4 = scmp.lt.s32.totalorder %s549_s15, %s549_s15 }
 0x124   :  { %p556_p5 = por %p555_p4, %p554_p3 }
 0x126   :  { %p557_p6 = pnand %p556_p5, %p550_p2 }
 0x128   :  { %560 = shalt.err (!%p557_p6)
}
 0x129   :  { %s561_s18 = scalar_lea.hbm %s789_s4, 128 }
 0x12a   :  { %p562_p7 = scmp.ne.s32.totalorder %s789_s4, %s561_s18  ;;  %p565_p8 = scmp.lt.u32.totalorder %s561_s18, %s789_s4 }
 0x12c   :  { %p567_p9 = pnand %p565_p8, %p562_p7 }
 0x12e   :  { %570 = shalt.err (!%p567_p9)
}
 0x12f   :  { %s633_s7 = smov 64   ;;  %s634_s2 = smov 4   ;;  %450 = vst [vmem:[#allocation6] sm:$0xff] %v449_v30  }
 0x130   :  { %353 = dma.vmem_to_hbm [thread:$0]  %s710_s24, 128, %s789_s4, [#allocation4], %s633_s7, %s633_s7, %s634_s2  }
 0x131   :  { %s571_s25 = scalar_lea.vmem %s712_s22, 128  ;;  %p576_p11 = scmp.lt.s32.totalorder %s712_s22, %s712_s22 }
 0x132   :  { %p572_p10 = scmp.ne.s32.totalorder %s712_s22, %s571_s25  ;;  %p577_p12 = scmp.lt.s32.totalorder %s571_s25, %s571_s25 }
 0x134   :  { %p578_p13 = por %p577_p12, %p576_p11 }
 0x136   :  { %p579_p0 = pnand %p578_p13, %p572_p10 }
 0x138   :  { %582 = shalt.err (!%p579_p0)
}
 0x139   :  { %s583_s29 = scalar_lea.hbm %s790_s5, 128 }
 0x13a   :  { %p584_p1 = scmp.ne.s32.totalorder %s790_s5, %s583_s29  ;;  %p587_p2 = scmp.lt.u32.totalorder %s583_s29, %s790_s5 }
 0x13c   :  { %p589_p3 = pnand %p587_p2, %p584_p1 }
 0x13e   :  { %592 = shalt.err (!%p589_p3)
}
 0x13f   :  { %365 = dma.vmem_to_hbm [thread:$0]  %s712_s22, 128, %s790_s5, [#allocation7], %s633_s7, %s633_s7, %s634_s2  }
 0x140   :  { %s593_s11 = scalar_lea.vmem %s714_s26, 256  ;;  %p598_p5 = scmp.lt.s32.totalorder %s714_s26, %s714_s26 }
 0x141   :  { %p594_p4 = scmp.ne.s32.totalorder %s714_s26, %s593_s11  ;;  %p599_p6 = scmp.lt.s32.totalorder %s593_s11, %s593_s11 }
 0x143   :  { %p600_p7 = por %p599_p6, %p598_p5 }
 0x145   :  { %p601_p8 = pnand %p600_p7, %p594_p4 }
 0x147   :  { %604 = shalt.err (!%p601_p8)
}
 0x148   :  { %s605_s15 = scalar_lea.hbm %s791_s6, 256 }
 0x149   :  { %p606_p9 = scmp.ne.s32.totalorder %s791_s6, %s605_s15  ;;  %p609_p10 = scmp.lt.u32.totalorder %s605_s15, %s791_s6 }
 0x14b   :  { %p611_p11 = pnand %p609_p10, %p606_p9 }
 0x14d   :  { %614 = shalt.err (!%p611_p11)
}
 0x14e   :  { %377 = dma.vmem_to_hbm [thread:$0]  %s714_s26, 256, %s791_s6, [#allocation7], %s631_s12, %s631_s12, %s632_s13  }
 0x14f   :  { %617 = dma.done.wait [#allocation4], 128  }
 0x150   :  { %618 = vsyncadd [#allocation4], 4294967168 }
 0x151   :  { %619 = dma.done.wait [#allocation7], 384  }
 0x152   :  { %620 = vsyncadd [#allocation7], 4294966912 }
 0x153   :  { %621 = dma.done.wait [#allocation10], 256  }
 0x154   :  { %622 = vsyncadd [#allocation10], 4294967040 }
 0x155   :  { %402 = vsyncpa [#allocation3], 1 }
 0x156   :  { %403 = vsyncpa [#allocation4], 1 }
 0x157   :  { %404 = vsyncpa [#allocation7], 1 }
 0x158   :  { %405 = vsyncpa [#allocation10], 1 }

</bundles_post_ra>
